<compile_context>
chip_gen: v7x
topology: tpu7x:2x2x1
jax: 0.10.0
libtpu: 0.0.40
codegen_flags: <defaults>
</compile_context>

<pallas_src>
import functools

import jax
import jax.numpy as jnp
from jax.experimental import pallas as pl
from jax.experimental.pallas import tpu as pltpu


# ----------------------------- helpers ------------------------------------- #

def _round_up(x, m):
    return (x + m - 1) // m * m


def _cdiv(a, b):
    return -(-a // b)


def _phase_plan(k, s, p):
    """Sub-pixel decomposition bookkeeping (identical for D/H/W).

    Writing the output index as o = m*s + phi, the transposed conv becomes
        y[o] = sum_j x[m + (c_phi - j)] * w[r_phi + j*s]
    with r_phi = (phi + p) % s, c_phi = (phi + p) // s.  Every tap is placed at
    window offset u = (c_phi - j) - lo, so all phases become one dense direct
    conv with window T over a lightly padded input.
    Returns (T, lo, plan) with plan = [(phi, u, k_tap), ...]  (len == k).
    """
    entries = []
    for phi in range(s):
        r = (phi + p) % s
        c = (phi + p) // s
        j = 0
        while r + j * s < k:
            entries.append((phi, c - j, r + j * s))
            j += 1
    offs = [e[1] for e in entries]
    lo, hi = min(offs), max(offs)
    T = hi - lo + 1
    plan = [(phi, off - lo, kt) for (phi, off, kt) in entries]
    return T, lo, plan


def _row_tile(m, cap=2048):
    """Largest row tile that evenly tiles m, <= cap, multiple of 8 (or m)."""
    if m <= cap:
        return m
    for t in range(cap, 0, -1):
        if m % t == 0 and t % 8 == 0:
            return t
    return m


_VMEM_LIMIT = 64 * 1024 * 1024  # generous; re-derive for very large decoders on v7x (64 MiB VMEM)


# ----------------------------- Pallas kernels ------------------------------ #

def _fused_deconv_kernel(x_ref, b_ref, conv_ref, sum_ref, ssq_ref, acc_ref):
    """Fused im2col + MXU matmul + BN partial statistics.

    One (n, depth-plane) output block; grid axis 2 sweeps the T depth taps.
      x_ref   : (Hq, Wq, Cin)     bf16  padded input plane (depth = m + u)
      b_ref   : (T, T*T*Cin, Np)  bf16  flattened sub-pixel weight (resident)
      conv_ref: (Mh*Mw, Np)       bf16  conv output block
      sum_ref : (8, Np)           f32   per-block column sums (BN stats)
      ssq_ref : (8, Np)           f32   per-block column sums of squares
      acc_ref : (Mh*Mw, Np)       f32   VMEM accumulator scratch
    """
    T = b_ref.shape[0]
    Hq, Wq, Cin = x_ref.shape
    Mh, Mw = Hq - T + 1, Wq - T + 1
    ud = pl.program_id(2)

    @pl.when(ud == 0)
    def _init():
        acc_ref[...] = jnp.zeros_like(acc_ref)

    # in-VMEM im2col over the T*T in-plane taps (no HBM traffic)
    taps = [x_ref[uh:uh + Mh, uw:uw + Mw, :]
            for uh in range(T) for uw in range(T)]
    a = jnp.concatenate(taps, axis=-1) if len(taps) > 1 else taps[0]
    a = a.reshape(Mh * Mw, T * T * Cin)          # bf16, columns = (uh, uw, cin)

    acc_ref[...] += jnp.dot(a, b_ref[ud], preferred_element_type=jnp.float32)

    @pl.when(ud == T - 1)
    def _finalize():
        acc = acc_ref[...]
        conv_ref[...] = acc.astype(conv_ref.dtype)
        sum_ref[...] = jnp.broadcast_to(
            jnp.sum(acc, axis=0, keepdims=True), sum_ref.shape)
        ssq_ref[...] = jnp.broadcast_to(
            jnp.sum(acc * acc, axis=0, keepdims=True), ssq_ref.shape)


def _scale_shift_relu_kernel(x_ref, scale_ref, shift_ref, o_ref, *, relu):
    # y = x * scale + shift (per-column); optional ReLU.  f32 math (v5e-safe).
    y = x_ref[...].astype(jnp.float32) * scale_ref[...] + shift_ref[...]
    if relu:
        y = jnp.maximum(y, 0.0)
    o_ref[...] = y


# ------------------------------ Deconv3d forward ---------------------------- #

def deconv3d_forward(x_ncdhw, weight, gamma, beta, bias, *,
                     stride=1, padding=0, output_padding=0,
                     relu=True, bn=True, eps=1e-5):
    """Matches PyTorch Deconv3d.forward (training-mode BN batch statistics).

    x_ncdhw : (N, Cin, D, H, W)
    weight  : (Cin, Cout, kD, kH, kW)   -- PyTorch ConvTranspose3d layout
    gamma, beta : (Cout,) BN affine params (used when bn=True)
    bias    : (Cout,) or None (ConvTranspose3d bias, only when bn=False)
    returns : (N, Cout, Do, Ho, Wo) float32
    """
    N, Cin, Di, Hi, Wi = x_ncdhw.shape
    Cin_w, Cout, kD, kH, kW = weight.shape
    assert Cin == Cin_w
    assert kD == kH == kW, "isotropic kernel expected"
    k = kD
    s, p, op = stride, padding, output_padding
    assert s in (1, 2)

    Do = (Di - 1) * s - 2 * p + k + op
    Ho = (Hi - 1) * s - 2 * p + k + op
    Wo = (Wi - 1) * s - 2 * p + k + op

    T, lo, plan = _phase_plan(k, s, p)
    assert lo <= 0, "unsupported padding configuration"
    Md, Mh, Mw = _cdiv(Do, s), _cdiv(Ho, s), _cdiv(Wo, s)
    s3 = s ** 3
    ncols = s3 * Cout
    Np = _round_up(ncols, 128)

    if bn and s > 1 and Do % s != 0:
        # TODO(synk): masked BN statistics for output_padding configs where the
        # phase grid overhangs the true output; not needed for the MVSNet
        # decoder config (k=3, s=2, p=1, output_padding=1).
        raise NotImplementedError("BN batch stats need (k + op - 2p) % s == 0")

    # --- padded channels-last bf16 input (NO zero-upsampling, no im2col copy) ---
    x = jnp.transpose(x_ncdhw, (0, 2, 3, 4, 1)).astype(jnp.float32)
    Dq, Hq, Wq = Md + T - 1, Mh + T - 1, Mw + T - 1
    left = -lo
    xq = jnp.pad(x, ((0, 0),
                     (left, max(0, Dq - (Di + left))),
                     (left, max(0, Hq - (Hi + left))),
                     (left, max(0, Wq - (Wi + left))),
                     (0, 0)))[:, :Dq, :Hq, :Wq, :].astype(jnp.bfloat16)

    # --- sub-pixel weight: rows (u_h, u_w, cin) per depth-tap, cols (phase, cout)
    wsub = jnp.zeros((T, T, T, Cin, s, s, s, Cout), jnp.float32)
    for (fd, ud_, kd_) in plan:
        for (fh, uh_, kh_) in plan:
            for (fw, uw_, kw_) in plan:
                wsub = wsub.at[ud_, uh_, uw_, :, fd, fh, fw, :].set(
                    weight[:, :, kd_, kh_, kw_].astype(jnp.float32))
    b = wsub.reshape(T, T * T * Cin, ncols)
    b = jnp.pad(b, ((0, 0), (0, 0), (0, Np - ncols))).astype(jnp.bfloat16)

    # --- kernel 1: fused im2col + matmul + BN partial stats ---
    conv, psum, pssq = pl.pallas_call(
        _fused_deconv_kernel,
        out_shape=(
            jax.ShapeDtypeStruct((N, Md, Mh * Mw, Np), jnp.bfloat16),
            jax.ShapeDtypeStruct((N, Md, 8, Np), jnp.float32),
            jax.ShapeDtypeStruct((N, Md, 8, Np), jnp.float32),
        ),
        grid=(N, Md, T),
        in_specs=[
            pl.BlockSpec((None, None, Hq, Wq, Cin),
                         lambda n, m, u: (n, m + u, 0, 0, 0)),
            pl.BlockSpec((T, T * T * Cin, Np),
                         lambda n, m, u: (0, 0, 0)),
        ],
        out_specs=(
            pl.BlockSpec((None, None, Mh * Mw, Np), lambda n, m, u: (n, m, 0, 0)),
            pl.BlockSpec((None, None, 8, Np), lambda n, m, u: (n, m, 0, 0)),
            pl.BlockSpec((None, None, 8, Np), lambda n, m, u: (n, m, 0, 0)),
        ),
        scratch_shapes=[pltpu.VMEM((Mh * Mw, Np), jnp.float32)],
        compiler_params=pltpu.CompilerParams(
            dimension_semantics=("parallel", "parallel", "arbitrary"),
            vmem_limit_bytes=_VMEM_LIMIT,
        ),
    )(xq, b)

    M2 = N * Md * Mh * Mw

    # --- tiny per-channel BN combine (pool over batch, space and the s^3 phases)
    if bn:
        tot = jnp.sum(psum[:, :, 0, :ncols], axis=(0, 1)).reshape(s3, Cout).sum(0)
        tsq = jnp.sum(pssq[:, :, 0, :ncols], axis=(0, 1)).reshape(s3, Cout).sum(0)
        cnt = M2 * s3                                   # == N * Do * Ho * Wo
        mean = tot / cnt
        # biased variance (as PyTorch uses for normalization); f32 partial sums,
        # guard tiny negatives from E[x^2]-E[x]^2 cancellation
        var = jnp.maximum(tsq / cnt - mean * mean, 0.0)
        scale_c = gamma.astype(jnp.float32) / jnp.sqrt(var + eps)
        shift_c = beta.astype(jnp.float32) - mean * scale_c
        # TODO(synk): running_mean/running_var momentum update is a training
        # side effect and is not part of the returned forward value.
    else:
        scale_c = jnp.ones((Cout,), jnp.float32)
        shift_c = (bias.astype(jnp.float32) if bias is not None
                   else jnp.zeros((Cout,), jnp.float32))

    scale_p = jnp.zeros((Np,), jnp.float32).at[:ncols].set(jnp.tile(scale_c, s3))
    shift_p = jnp.zeros((Np,), jnp.float32).at[:ncols].set(jnp.tile(shift_c, s3))

    # --- kernel 2: fused scale/shift(+ReLU) epilogue, lane-dense large tiles ---
    conv2 = conv.reshape(M2, Np)
    tm = _row_tile(M2)
    y2 = pl.pallas_call(
        functools.partial(_scale_shift_relu_kernel, relu=relu),
        out_shape=jax.ShapeDtypeStruct((M2, Np), jnp.float32),
        grid=(M2 // tm,),
        in_specs=[
            pl.BlockSpec((tm, Np), lambda i: (i, 0)),
            pl.BlockSpec((1, Np), lambda i: (0, 0)),
            pl.BlockSpec((1, Np), lambda i: (0, 0)),
        ],
        out_specs=pl.BlockSpec((tm, Np), lambda i: (i, 0)),
        compiler_params=pltpu.CompilerParams(
            dimension_semantics=("parallel",),
            vmem_limit_bytes=_VMEM_LIMIT,
        ),
    )(conv2, scale_p.reshape(1, Np), shift_p.reshape(1, Np))

    # --- phase interleave + NDHWC->NCDHW: one fused XLA transpose pass ---
    y = y2[:, :ncols].reshape(N, Md, Mh, Mw, s, s, s, Cout)
    y = jnp.transpose(y, (0, 7, 1, 4, 2, 5, 3, 6))
    y = y.reshape(N, Cout, Md * s, Mh * s, Mw * s)
    return y[:, :, :Do, :Ho, :Wo]


# --------------------------------- demo ------------------------------------ #

if __name__ == "__main__":
    key = jax.random.PRNGKey(0)
    k_x, k_w, k_b = jax.random.split(key, 3)

    # Deconv3d(in_channels=8, out_channels=4, kernel_size=3, stride=2,
    #          padding=1, output_padding=1, relu=True, bn=True)  [MVSNet decoder]
    N, Cin, Cout, D, H, W = 2, 8, 4, 4, 4, 4
    k = 3

    x = jax.random.normal(k_x, (N, Cin, D, H, W), jnp.float32)

    fan_in = Cin * k ** 3
    fan_out = Cout * k ** 3
    w_std = (2.0 / (fan_in + fan_out)) ** 0.5
    weight = w_std * jax.random.normal(k_w, (Cin, Cout, k, k, k), jnp.float32)

    gamma = jnp.ones((Cout,), jnp.float32)
    beta = jnp.zeros((Cout,), jnp.float32)
    bias = 0.1 * jax.random.normal(k_b, (Cout,), jnp.float32)

    def reference(x, weight, gamma, beta, bias, stride, padding, output_padding,
                  relu, bn, eps=1e-5):
        # pure-JAX reference: zero-insertion upsample + flipped-kernel im2col
        n, cin, d, h, w = x.shape
        _, cout, kd, kh, kw = weight.shape
        s, p, op = stride, padding, output_padding
        xc = jnp.transpose(x, (0, 2, 3, 4, 1)).astype(jnp.float32)
        du, hu, wu = (d - 1) * s + 1, (h - 1) * s + 1, (w - 1) * s + 1
        xu = jnp.zeros((n, du, hu, wu, cin), jnp.float32)
        xu = xu.at[:, ::s, ::s, ::s, :].set(xc)
        pd, ph, pw = kd - 1 - p, kh - 1 - p, kw - 1 - p
        xp = jnp.pad(xu, ((0, 0), (pd, pd + op), (ph, ph + op), (pw, pw + op), (0, 0)))
        do = (d - 1) * s - 2 * p + kd + op
        ho = (h - 1) * s - 2 * p + kh + op
        wo = (w - 1) * s - 2 * p + kw + op
        taps = [xp[:, a:a + do, b:b + ho, c:c + wo, :]
                for a in range(kd) for b in range(kh) for c in range(kw)]
        pat = jnp.stack(taps, axis=-2).reshape(n * do * ho * wo, kd * kh * kw * cin)
        wm = jnp.transpose(weight[:, :, ::-1, ::-1, ::-1], (2, 3, 4, 0, 1)).reshape(-1, cout)
        conv = pat @ wm
        if bn:
            mu = conv.mean(0)
            var = ((conv - mu) ** 2).mean(0)
            y = (conv - mu) / jnp.sqrt(var + eps) * gamma + beta
        else:
            y = conv + (bias if bias is not None else 0.0)
        if relu:
            y = jnp.maximum(y, 0.0)
        y = y.reshape(n, do, ho, wo, cout)
        return jnp.transpose(y, (0, 4, 1, 2, 3))

    # --- case 1: stride 2, BN + ReLU (the MVSNet decoder config) ---
    out = deconv3d_forward(x, weight, gamma, beta, None,
                           stride=2, padding=1, output_padding=1,
                           relu=True, bn=True)
    out = jax.block_until_ready(out)
    assert out.shape == (N, Cout, 2 * D, 2 * H, 2 * W), out.shape
    ref = jax.block_until_ready(
        reference(x, weight, gamma, beta, None, 2, 1, 1, True, True))
    assert bool(jnp.all(jnp.isfinite(out)))
    assert bool(jnp.allclose(out, ref, atol=5e-2, rtol=5e-2)), \
        float(jnp.max(jnp.abs(out - ref)))

    # --- case 2: stride 1, conv bias + ReLU, no BN ---
    out1 = deconv3d_forward(x, weight, gamma, beta, bias,
                            stride=1, padding=1, output_padding=0,
                            relu=True, bn=False)
    out1 = jax.block_until_ready(out1)
    ref1 = jax.block_until_ready(
        reference(x, weight, gamma, beta, bias, 1, 1, 0, True, False))
    assert out1.shape == ref1.shape == (N, Cout, D, H, W)
    assert bool(jnp.allclose(out1, ref1, atol=5e-2, rtol=5e-2)), \
        float(jnp.max(jnp.abs(out1 - ref1)))

    print("KERNEL_OK")
</pallas_src>

<mosaic_0001>
module attributes {stable_mosaic.version = 11 : i64} {
  func.func @_fused_deconv_kernel(%arg0: i32, %arg1: i32, %arg2: i32, %arg3: memref<1x1x5x5x8xbf16, #tpu.memory_space<vmem>>, %arg4: memref<2x32x128xbf16, #tpu.memory_space<vmem>>, %arg5: memref<1x1x16x128xbf16, #tpu.memory_space<vmem>>, %arg6: memref<1x1x8x128xf32, #tpu.memory_space<vmem>>, %arg7: memref<1x1x8x128xf32, #tpu.memory_space<vmem>>, %arg8: memref<16x128xf32, #tpu.memory_space<vmem>>) attributes {dimension_semantics = [#tpu.dimension_semantics<parallel>, #tpu.dimension_semantics<parallel>, #tpu.dimension_semantics<arbitrary>], iteration_bounds = array<i64: 2, 4, 2>, scalar_prefetch = 0 : i64, scratch_operands = 1 : i64, tpu.core_type = #tpu.core_type<tc>, window_params = [{transform_indices = @transform_0, window_bounds = array<i64: 1, 1, 5, 5, 8>}, {pipeline_mode = #tpu.pipeline_mode<synchronous>, transform_indices = @transform_1, window_bounds = array<i64: 2, 32, 128>}, {transform_indices = @transform_2, window_bounds = array<i64: 1, 1, 16, 128>}, {transform_indices = @transform_3, window_bounds = array<i64: 1, 1, 8, 128>}, {transform_indices = @transform_4, window_bounds = array<i64: 1, 1, 8, 128>}]} {
    %c0_i32 = arith.constant 0 : i32
    %0 = arith.cmpi eq, %arg2, %c0_i32 : i32
    %1 = arith.extui %0 : i1 to i32
    %c0_i32_0 = arith.constant 0 : i32
    %2 = arith.cmpi ne, %1, %c0_i32_0 : i32
    scf.if %2 {
      %cst_26 = arith.constant 0.000000e+00 : f32
      %23 = vector.broadcast %cst_26 : f32 to vector<16x128xf32>
      %c0_27 = arith.constant 0 : index
      %c0_28 = arith.constant 0 : index
      %24 = vector.load %arg8[%c0_27, %c0_28] : memref<16x128xf32, #tpu.memory_space<vmem>>, vector<16x128xf32>
      tpu.vector_store %arg8[%c0_27, %c0_28], %23 {strides = array<i32>} : memref<16x128xf32, #tpu.memory_space<vmem>>, vector<16x128xf32>,
    } else {
    }
    %c0 = arith.constant 0 : index
    %c0_1 = arith.constant 0 : index
    %c0_2 = arith.constant 0 : index
    %c0_3 = arith.constant 0 : index
    %c0_4 = arith.constant 0 : index
    %3 = vector.load %arg3[%c0, %c0_1, %c0_2, %c0_3, %c0_4] : memref<1x1x5x5x8xbf16, #tpu.memory_space<vmem>>, vector<1x1x4x4x8xbf16>
    %4 = vector.shape_cast %3 : vector<1x1x4x4x8xbf16> to vector<4x4x8xbf16>
    %c0_5 = arith.constant 0 : index
    %c0_6 = arith.constant 0 : index
    %c0_7 = arith.constant 0 : index
    %c1 = arith.constant 1 : index
    %c0_8 = arith.constant 0 : index
    %5 = vector.load %arg3[%c0_5, %c0_6, %c0_7, %c1, %c0_8] : memref<1x1x5x5x8xbf16, #tpu.memory_space<vmem>>, vector<1x1x4x4x8xbf16>
    %6 = vector.shape_cast %5 : vector<1x1x4x4x8xbf16> to vector<4x4x8xbf16>
    %c0_9 = arith.constant 0 : index
    %c0_10 = arith.constant 0 : index
    %c1_11 = arith.constant 1 : index
    %c0_12 = arith.constant 0 : index
    %c0_13 = arith.constant 0 : index
    %7 = vector.load %arg3[%c0_9, %c0_10, %c1_11, %c0_12, %c0_13] : memref<1x1x5x5x8xbf16, #tpu.memory_space<vmem>>, vector<1x1x4x4x8xbf16>
    %8 = vector.shape_cast %7 : vector<1x1x4x4x8xbf16> to vector<4x4x8xbf16>
    %c0_14 = arith.constant 0 : index
    %c0_15 = arith.constant 0 : index
    %c1_16 = arith.constant 1 : index
    %c1_17 = arith.constant 1 : index
    %c0_18 = arith.constant 0 : index
    %9 = vector.load %arg3[%c0_14, %c0_15, %c1_16, %c1_17, %c0_18] : memref<1x1x5x5x8xbf16, #tpu.memory_space<vmem>>, vector<1x1x4x4x8xbf16>
    %10 = vector.shape_cast %9 : vector<1x1x4x4x8xbf16> to vector<4x4x8xbf16>
    %11 = tpu.concatenate %4, %6, %8, %10 in 2 : vector<4x4x8xbf16>, vector<4x4x8xbf16>, vector<4x4x8xbf16>, vector<4x4x8xbf16> -> vector<4x4x32xbf16>
    %12 = vector.shape_cast %11 : vector<4x4x32xbf16> to vector<16x32xbf16>
    %c0_19 = arith.constant 0 : index
    %c0_20 = arith.constant 0 : index
    %13 = vector.load %arg8[%c0_19, %c0_20] : memref<16x128xf32, #tpu.memory_space<vmem>>, vector<16x128xf32>
    %14 = arith.index_cast %arg2 : i32 to index
    %c0_21 = arith.constant 0 : index
    %c0_22 = arith.constant 0 : index
    %15 = vector.load %arg4[%14, %c0_21, %c0_22] : memref<2x32x128xbf16, #tpu.memory_space<vmem>>, vector<1x32x128xbf16>
    %16 = vector.shape_cast %15 : vector<1x32x128xbf16> to vector<32x128xbf16>
    %cst = arith.constant dense<0.000000e+00> : vector<16x128xf32>
    %17 = tpu.matmul %12, %16, %cst {dimension_numbers = #tpu.dot_dimension_numbers<[1], [0], [0], [1], [0, 0, 1, 1], [], []>} : vector<16x32xbf16>, vector<32x128xbf16>, vector<16x128xf32> -> vector<16x128xf32>
    %18 = arith.addf %13, %17 : vector<16x128xf32>
    %c0_23 = arith.constant 0 : index
    %c0_24 = arith.constant 0 : index
    %19 = vector.load %arg8[%c0_23, %c0_24] : memref<16x128xf32, #tpu.memory_space<vmem>>, vector<16x128xf32>
    tpu.vector_store %arg8[%c0_23, %c0_24], %18 {strides = array<i32>} : memref<16x128xf32, #tpu.memory_space<vmem>>, vector<16x128xf32>,
    %c1_i32 = arith.constant 1 : i32
    %20 = arith.cmpi eq, %arg2, %c1_i32 : i32
    %21 = arith.extui %20 : i1 to i32
    %c0_i32_25 = arith.constant 0 : i32
    %22 = arith.cmpi ne, %21, %c0_i32_25 : i32
    scf.if %22 {
      %c0_26 = arith.constant 0 : index
      %c0_27 = arith.constant 0 : index
      %23 = vector.load %arg8[%c0_26, %c0_27] : memref<16x128xf32, #tpu.memory_space<vmem>>, vector<16x128xf32>
      %24 = arith.truncf %23 : vector<16x128xf32> to vector<16x128xbf16>
      %c0_28 = arith.constant 0 : index
      %c0_29 = arith.constant 0 : index
      %c0_30 = arith.constant 0 : index
      %c0_31 = arith.constant 0 : index
      %25 = vector.load %arg5[%c0_28, %c0_29, %c0_30, %c0_31] : memref<1x1x16x128xbf16, #tpu.memory_space<vmem>>, vector<1x1x16x128xbf16>
      %26 = vector.shape_cast %25 : vector<1x1x16x128xbf16> to vector<16x128xbf16>
      %27 = vector.shape_cast %24 : vector<16x128xbf16> to vector<1x1x16x128xbf16>
      tpu.vector_store %arg5[%c0_28, %c0_29, %c0_30, %c0_31], %27 {strides = array<i32>} : memref<1x1x16x128xbf16, #tpu.memory_space<vmem>>, vector<1x1x16x128xbf16>,
      %cst_32 = arith.constant dense<0.000000e+00> : vector<128xf32>
      %28 = vector.multi_reduction <add>, %23, %cst_32 [0] : vector<16x128xf32> to vector<128xf32>
      %29 = vector.shape_cast %28 : vector<128xf32> to vector<1x128xf32>
      %30 = vector.shape_cast %29 : vector<1x128xf32> to vector<1x128xf32>
      %31 = vector.broadcast %30 : vector<1x128xf32> to vector<8x128xf32>
      %c0_33 = arith.constant 0 : index
      %c0_34 = arith.constant 0 : index
      %c0_35 = arith.constant 0 : index
      %c0_36 = arith.constant 0 : index
      %32 = vector.load %arg6[%c0_33, %c0_34, %c0_35, %c0_36] : memref<1x1x8x128xf32, #tpu.memory_space<vmem>>, vector<1x1x8x128xf32>
      %33 = vector.shape_cast %32 : vector<1x1x8x128xf32> to vector<8x128xf32>
      %34 = vector.shape_cast %31 : vector<8x128xf32> to vector<1x1x8x128xf32>
      tpu.vector_store %arg6[%c0_33, %c0_34, %c0_35, %c0_36], %34 {strides = array<i32>} : memref<1x1x8x128xf32, #tpu.memory_space<vmem>>, vector<1x1x8x128xf32>,
      %35 = arith.mulf %23, %23 : vector<16x128xf32>
      %cst_37 = arith.constant dense<0.000000e+00> : vector<128xf32>
      %36 = vector.multi_reduction <add>, %35, %cst_37 [0] : vector<16x128xf32> to vector<128xf32>
      %37 = vector.shape_cast %36 : vector<128xf32> to vector<1x128xf32>
      %38 = vector.shape_cast %37 : vector<1x128xf32> to vector<1x128xf32>
      %39 = vector.broadcast %38 : vector<1x128xf32> to vector<8x128xf32>
      %c0_38 = arith.constant 0 : index
      %c0_39 = arith.constant 0 : index
      %c0_40 = arith.constant 0 : index
      %c0_41 = arith.constant 0 : index
      %40 = vector.load %arg7[%c0_38, %c0_39, %c0_40, %c0_41] : memref<1x1x8x128xf32, #tpu.memory_space<vmem>>, vector<1x1x8x128xf32>
      %41 = vector.shape_cast %40 : vector<1x1x8x128xf32> to vector<8x128xf32>
      %42 = vector.shape_cast %39 : vector<8x128xf32> to vector<1x1x8x128xf32>
      tpu.vector_store %arg7[%c0_38, %c0_39, %c0_40, %c0_41], %42 {strides = array<i32>} : memref<1x1x8x128xf32, #tpu.memory_space<vmem>>, vector<1x1x8x128xf32>,
    } else {
    }
    return
  }
  func.func @transform_0(%arg0: i32, %arg1: i32, %arg2: i32) -> (i32, i32, i32, i32, i32) {
    %0 = arith.addi %arg1, %arg2 : i32
    %c0_i32 = arith.constant 0 : i32
    %c0_i32_0 = arith.constant 0 : i32
    %c0_i32_1 = arith.constant 0 : i32
    %c0_i32_2 = arith.constant 0 : i32
    return %arg0, %0, %c0_i32, %c0_i32_0, %c0_i32_1 : i32, i32, i32, i32, i32
  }
  func.func @transform_1(%arg0: i32, %arg1: i32, %arg2: i32) -> (i32, i32, i32) {
    %c0_i32 = arith.constant 0 : i32
    %c0_i32_0 = arith.constant 0 : i32
    %c0_i32_1 = arith.constant 0 : i32
    %c0_i32_2 = arith.constant 0 : i32
    return %c0_i32, %c0_i32_0, %c0_i32_1 : i32, i32, i32
  }
  func.func @transform_2(%arg0: i32, %arg1: i32, %arg2: i32) -> (i32, i32, i32, i32) {
    %c0_i32 = arith.constant 0 : i32
    %c0_i32_0 = arith.constant 0 : i32
    %c0_i32_1 = arith.constant 0 : i32
    return %arg0, %arg1, %c0_i32, %c0_i32_0 : i32, i32, i32, i32
  }
  func.func @transform_3(%arg0: i32, %arg1: i32, %arg2: i32) -> (i32, i32, i32, i32) {
    %c0_i32 = arith.constant 0 : i32
    %c0_i32_0 = arith.constant 0 : i32
    %c0_i32_1 = arith.constant 0 : i32
    return %arg0, %arg1, %c0_i32, %c0_i32_0 : i32, i32, i32, i32
  }
  func.func @transform_4(%arg0: i32, %arg1: i32, %arg2: i32) -> (i32, i32, i32, i32) {
    %c0_i32 = arith.constant 0 : i32
    %c0_i32_0 = arith.constant 0 : i32
    %c0_i32_1 = arith.constant 0 : i32
    return %arg0, %arg1, %c0_i32, %c0_i32_0 : i32, i32, i32, i32
  }
}

</mosaic_0001>

<bundles_post_ra>
// kernel: tpu_custom_call.1
= control target key start
LH: loop header
LB: loop body
LE: loop exit
PB: predicated region body
PF: predicated region fallthrough
CT: control target
= control target key end

     0   :  { %s1766_s0 = inlined_call_operand.hbm [shape: bf16[2,5,5,5,8], index: 0, kind: input, shape index: {}]   ;;  %s1767_s1 = inlined_call_operand.hbm [shape: bf16[2,32,128], index: 1, kind: input, shape index: {}]   ;;  %s1768_s2 = inlined_call_operand.hbm [shape: bf16[2,4,16,128], index: 2, kind: output, shape index: {0}]   ;;  %s1769_s3 = inlined_call_operand.hbm [shape: f32[2,4,8,128], index: 3, kind: output, shape index: {1}]   ;;  %s1770_s4 = inlined_call_operand.hbm [shape: f32[2,4,8,128], index: 4, kind: output, shape index: {2}]  }
   0x1   :  { %1793 = sst [smem:[#allocation26_spill]] %s1767_s1 }
   0x2   :  { %1794 = sst [smem:[#allocation27_spill]] %s1768_s2 }
   0x3   :  { %1795 = sst [smem:[#allocation28_spill]] %s1769_s3 }
   0x4   :  { %1796 = sst [smem:[#allocation29_spill]] %s1770_s4 }
   0x5   :  { %10 = vsyncpa [#allocation4], 0 }
   0x6   :  { %12 = vsyncpa [#allocation4 + $0x1], 0 }
   0x7   :  { %13 = vsyncpa [#allocation7], 0 }
   0x8   :  { %14 = vsyncpa [#allocation5], 0 }
   0x9   :  { %16 = vsyncpa [#allocation5 + $0x1], 0 }
   0xa   :  { %17 = vsyncpa [#allocation10], 0 }
   0xb   :  { %19 = vsyncpa [#allocation10 + $0x1], 0  ;;  %s1350_s15 = smov 0   ;;  %s1352_s16 = smov 0  }
   0xc   :  { %s1354_s17 = smov 0   ;;  %s1356_s18 = smov 0  }
   0xd   :  { %s1358_s19 = smov 0   ;;  %s1360_s20 = smov 0  }
   0xe   :  { %s1362_s21 = smov 0   ;;  %s1364_s22 = smov 0  }
   0xf   :  { %s1366_s23 = smov 0   ;;  %s1368_s24 = smov 0  }
  0x10   :  { %s1370_s25 = smov 0   ;;  %s1372_s26 = smov 0  }
  0x11   :  { %s1374_s27 = smov 0  }
  0x12 LB: > { %1797 = sst [smem:[#allocation16_spill]] %s1259_s15  ;;  %s1414_s28 = sadd.s32 4294967295, %s1307_s27   ;;  %s1307_s27 = sphi %s1374_s27, %s25_s27   ;;  %s1303_s26 = sphi %s1372_s26, %s1846_s26   ;;  %s1299_s25 = sphi %s1370_s25, %s1837_s25   ;;  %s1295_s24 = sphi %s1368_s24, %s1836_s24   ;;  %s1291_s23 = sphi %s1366_s23, %s1845_s23   ;;  %s1287_s22 = sphi %s1364_s22, %s1835_s22   ;;  %s1283_s21 = sphi %s1362_s21, %s1834_s21   ;;  %s1279_s20 = sphi %s1360_s20, %s1844_s20   ;;  %s1275_s19 = sphi %s1358_s19, %s1843_s19   ;;  %s1271_s18 = sphi %s1356_s18, %s1842_s18   ;;  %s1267_s17 = sphi %s1354_s17, %s1841_s17   ;;  %s1263_s16 = sphi %s1352_s16, %s1840_s16   ;;  %s1259_s15 = sphi %s1350_s15, %s1839_s15  }
  0x13   : > { %1798 = sst [smem:[#allocation17_spill]] %s1287_s22  ;;  %s1771_s29 = sadd.s32 4294967294, %s1307_s27  }
  0x14   : > { %1799 = sst [smem:[#allocation18_spill]] %s1295_s24  ;;  %p68_p0 = scmp.ne.s32.totalorder %s1275_s19, %s1271_s18 }
  0x15   : > { %1800 = sst [smem:[#allocation19_spill]] %s1299_s25  ;;  %p1773_p1 = scmp.eq.s32.totalorder %s1414_s28, 0 }
  0x16   : > { %1801 = sst [smem:[#allocation20_spill]] %s1307_s27  ;;  %p114_p2 = scmp.ne.s32.totalorder %s1267_s17, %s1263_s16 }
  0x17   : > { %p1424_p3 = por %p1773_p1, %p68_p0  ;;  %p115_p4 = scmp.eq.s32.totalorder %s1414_s28, 15 }
  0x18   : > { %p120_p5 = scmp.ne.s32.totalorder %s1263_s16, %s1259_s15  ;;  %p121_p6 = scmp.eq.s32.totalorder %s1771_s29, 15 }
  0x19   : > { %s1802_s5 = scalar_select %p1424_p3, 1, 0 }
  0x1a   : > { %p1433_p7 = por %p115_p4, %p114_p2  ;;  %p810_p8 = scmp.ge.s32.totalorder %s1307_s27, 1 }
  0x1b   : > { %p1438_p9 = por %p121_p6, %p120_p5  ;;  %p184_p10 = scmp.lt.s32.totalorder %s1307_s27, 17 }
  0x1c   : > { %s1803_s6 = scalar_select %p1433_p7, 1, 0 }
  0x1d   : > { %s1805_s7 = scalar_select %p1438_p9, 1, 0 }
  0x1e   : > { %1804 = sst [smem:[#allocation21_spill]] %s1803_s6  ;;  %p1443_p11 = pnand %p810_p8, %p184_p10 }
  0x1f   : > { %1806 = sst [smem:[#allocation22_spill]] %s1805_s7  ;;  %s1309_s9 = smov [#allocation6]  }
  0x20   : > { %s1807_s8 = scalar_select %p1443_p11, 1, 0 }
  0x21   : > { %s196_s10 = sshll.u32 %s1309_s9, 4  ;;  %p895_p12 = pneg %p1443_p11  ;;  %s197_s10 = int_to_ptr.vmem [resolvable:$true] %s196_s10 }
  0x22   : > { %s1809_s1 = sld [smem:[#allocation26_spill]] }
  0x23   : > { %p1451_p13 = pnand %p895_p12, %p1773_p1 }
  0x25   : > { %p1049_p2 = pneg %p1451_p13 }
  0x28   : > { %s1047_s14 = scalar_lea.hbm %s1809_s1, 512 }
  0x29   : > { %p1048_p0 = scmp.ne.s32.totalorder %s1809_s1, %s1047_s14  ;;  %p1054_p6 = scmp.lt.u32.totalorder %s1047_s14, %s1809_s1 }
  0x2b   : > { %p1050_p4 = pnand %p1049_p2, %p1048_p0 }
  0x2d   : > { %p1051_p5 = pneg %p1050_p4 }
  0x2f   : > { %p1056_p8 = pnand %p1054_p6, %p1051_p5 }
  0x31   : > { %1059 = shalt.err (!%p1056_p8)
}
  0x32   : > { %s1060_s7 = scalar_lea.vmem %s197_s10, 512  ;;  %p1068_p9 = scmp.lt.s32.totalorder %s197_s10, %s197_s10 }
  0x33   : > { %p1061_p10 = scmp.ne.s32.totalorder %s197_s10, %s1060_s7  ;;  %p1069_p7 = scmp.lt.s32.totalorder %s1060_s7, %s1060_s7 }
  0x35   : > { %p1063_p12 = pnand %p1061_p10, %p1049_p2  ;;  %p1070_p3 = por %p1069_p7, %p1068_p9 }
  0x37   : > { %p1064_p1 = pneg %p1063_p12 }
  0x39   : > { %p1071_p11 = pnand %p1070_p3, %p1064_p1 }
  0x3b   : > { %1074 = shalt.err (!%p1071_p11)
}
  0x3c   : > { %s1777_s29 = smov 64   ;;  %s1778_s30 = smov 4  }
  0x3d   : > { %898 = dma.hbm_to_vmem [thread:$0]  (!%p1451_p13), %s1809_s1, 512, %s197_s10, [#allocation7], %s1777_s29, %s1777_s29, %s1778_s30  }
  0x3e   : > { %s37_s13 = sadd.s32 1, %s1295_s24  ;;  %s40_s14 = sadd.s32 1, %s1299_s25 }
  0x3f   : > { %p38_p1 = scmp.ge.s32.totalorder %s37_s13, 2  ;;  %s44_s18 = sadd.s32 1, %s1303_s26 }
  0x40   : > { %s1479_s9 = sadd.s32 %s1295_s24, %s1299_s25  ;;  %s55_s11 = sadd.s32 1, %s1279_s20 }
  0x41   : > { %s1848_s13 = smov (%p38_p1, %s37_s13), 0  ;;  %s1850_s14 = smov (!%p38_p1, %s40_s14), %s1299_s25 }
  0x42   : > { %1810 = sst [smem:[#allocation23_spill]] %s1848_s13  ;;  %p62_p3 = scmp.ne.s32.totalorder %s1279_s20, %s1275_s19 }
  0x43   : > { %p42_p7 = scmp.ge.s32.totalorder %s1850_s14, 4  ;;  %p63_p9 = scmp.eq.s32.totalorder %s1307_s27, 0 }
  0x44   : > { %p914_p11 = scmp.lt.s32.totalorder %s1307_s27, 16  ;;  %s210_s10 = sand.u32 1, %s1279_s20  }
  0x45   : > { %s1852_s14 = smov (%p42_p7, %s1850_s14), 0  ;;  %s1854_s18 = smov (!%p42_p7, %s44_s18), %s1303_s26 }
  0x46   : > { %1811 = sst [smem:[#allocation24_spill]] %s1852_s14  ;;  %s49_s7 = sadd.s32 %s1852_s14, %s1848_s13 }
  0x47   : > { %p64_p13 = por %p63_p9, %p62_p3  ;;  %p46_p0 = scmp.ge.s32.totalorder %s1854_s18, 2 }
  0x48   : > { %s51_s12 = ssub.s32 %s1479_s9, %s49_s7  ;;  %s100_s29 = ssub.s32 %s1299_s25, %s1852_s14 }
  0x49   : > { %s1856_s18 = smov (%p46_p0, %s1854_s18), 0  ;;  %s879_s30 = smul.u32 20, %s210_s10 }
  0x4a   : > { %1812 = sst [smem:[#allocation25_spill]] %s1856_s18  ;;  %p1500_p2 = pnand %p914_p11, %p64_p13 }
  0x4b   : > { %s50_s24 = ssub.s32 %s1303_s26, %s1856_s18  ;;  %s880_s15 = smul.u32 5, %s1479_s9 }
  0x4c   : > { %s52_s27 = sor.u32 %s51_s12, %s50_s24  ;;  %s101_s4 = sor.u32 %s100_s29, %s50_s24 }
  0x4d   : > { %p53_p4 = scmp.eq.s32.totalorder %s52_s27, 0  ;;  %p102_p5 = scmp.eq.s32.totalorder %s101_s4, 0 }
  0x4e   : > { %s881_s13 = smul.u32 25, %s1303_s26  ;;  %s1814_s7 = sadd.s32 1, %s1267_s17 }
  0x4f   : > { %s1509_s2 = scalar_select %p53_p4, %s1279_s20, %s55_s11  }
  0x50   : > { %s1514_s14 = scalar_select %p102_p5, %s1267_s17, %s1814_s7  }
  0x51   : > { %s221_s25 = sadd.s32 %s881_s13, %s880_s15  ;;  %s214_s3 = scalar_lea.vmem [#allocation3], %s879_s30 }
  0x52   : > { %s224_s6 = sshll.u32 %s214_s3, 4  ;;  %s813_s22 = sshll.u32 %s221_s25, 6  ;;  %s1516_s6 = int_to_ptr.vmem [resolvable:$true] %s224_s6 }
  0x53   : > { %s1521_s12 = scalar_lea.hbm %s1766_s0, %s813_s22  ;;  %s1523_s4 = scalar_lea.sflag [#allocation4], %s210_s10 }
  0x54   : > { %s1075_s24 = scalar_lea.hbm %s1521_s12, 320  ;;  %p1077_p8 = pneg %p1500_p2 }
  0x55   : > { %p1076_p6 = scmp.ne.s32.totalorder %s1521_s12, %s1075_s24  ;;  %s1080_s25 = scalar_lea.hbm %s1766_s0, 3200 }
  0x56   : > { %p1081_p1 = scmp.lt.u32.totalorder %s1521_s12, %s1766_s0  ;;  %p1082_p3 = scmp.lt.u32.totalorder %s1080_s25, %s1075_s24 }
  0x57   : > { %p1078_p10 = pnand %p1077_p8, %p1076_p6  ;;  %p1084_p9 = scmp.lt.u32.totalorder %s1075_s24, %s1521_s12 }
  0x58   : > { %p1083_p7 = por %p1082_p3, %p1081_p1 }
  0x59   : > { %p1079_p12 = pneg %p1078_p10 }
  0x5a   : > { %p1085_p11 = por %p1084_p9, %p1083_p7 }
  0x5c   : > { %p1086_p13 = pnand %p1085_p11, %p1079_p12 }
  0x5e   : > { %1089 = shalt.err (!%p1086_p13)
}
  0x5f   : > { %s1090_s29 = scalar_lea.vmem %s1516_s6, 320  ;;  %s1312_s30 = smov [#allocation3]  }
  0x60   : > { %p1091_p0 = scmp.ne.s32.totalorder %s1516_s6, %s1090_s29  ;;  %s1095_s13 = sshll.u32 %s1312_s30, 4  ;;  %s1096_s13 = int_to_ptr.vmem [resolvable:$false] %s1095_s13 }
  0x61   : > { %s1097_s18 = scalar_lea.vmem %s1096_s13, 640  ;;  %p1098_p6 = scmp.lt.s32.totalorder %s1516_s6, %s1096_s13 }
  0x62   : > { %p1093_p4 = pnand %p1091_p0, %p1077_p8  ;;  %p1099_p10 = scmp.lt.s32.totalorder %s1097_s18, %s1090_s29 }
  0x64   : > { %p1094_p5 = pneg %p1093_p4  ;;  %p1100_p1 = por %p1099_p10, %p1098_p6 }
  0x66   : > { %p1101_p3 = pnand %p1100_p1, %p1094_p5 }
  0x68   : > { %1104 = shalt.err (!%p1101_p3)
}
  0x69   : > { %s1815_s11 = smov 4   ;;  %s1816_s10 = smov 64  }
  0x6a   : > { %902 = dma.hbm_to_vmem [thread:$0]  (!%p1500_p2), %s1521_s12, 320, %s1516_s6, %s1523_s4, %s1816_s10, %s1816_s10, %s1815_s11  }
  0x6b   : > { %p1817_p8 = scmp.ne.s32.totalorder %s1807_s8, 0 }
  0x6c   : > { %s238_s7 = sand.u32 (!%p1817_p8), 1, %s1275_s19   ;;  %p1818_p12 = scmp.ne.s32.totalorder (!%p1817_p8), %s1802_s5, 0 }
  0x6d   : > { %236 = sbr.rel (%p1817_p8) target bundleno = 598 (0x256), region = 28  ;;  %s239_s24 = scalar_lea.sflag (!%p1817_p8), [#allocation4], %s238_s7 }
  0x6e   : > { %s882_s9 = smul.u32 (!%p1817_p8), 20, %s238_s7 }
  0x70   : > { %s1557_s3 = scalar_lea.vmem (!%p1817_p8), [#allocation3], %s882_s9 }
  0x74   : > { %1242 = dma.done.wait (%p1818_p12), %s239_s24, 320  }
  0x75   : > { %1244 = vsyncadd (%p1818_p12), %s239_s24, 4294966976  ;;  %p1819_p7 = scmp.eq.s32.totalorder %s1414_s28, 0 }
  0x77   : > { %1246 = dma.done.wait (%p1819_p7), [#allocation7], 512   ;;  %p1820_p2 = pmov %p1819_p7 }
  0x78   : > { %s264_s1 = sand.u32 1, %s1263_s16   ;;  %p819_p9 = scmp.ne.s32.totalorder %s1283_s21, 0 }
  0x79   : > { %1248 = vsyncadd (%p1820_p2), [#allocation7], 4294966784  ;;  %s1570_s6 = sshll.u32 %s264_s1, 3  ;;  %v1313_v0 = vmov (!%p819_p9), 0.0  }
  0x7a   : > { %s266_s8 = scalar_lea.vmem [#allocation8], %s1570_s6  ;;  %s273_s12 = scalar_lea.vmem [#allocation9], %s1570_s6  ;;  %287 = vst [vmem:[#allocation2] sm:$0xff] (!%p819_p9), %v1313_v0  ;;  %288 = vst [vmem:[#allocation2 + $0x8] sm:$0xff] (!%p819_p9), %v1313_v0 }
  0x7b   : > { %s280_s4 = scalar_lea.vmem [#allocation11], %s1570_s6  ;;  %286 = sbr.rel (%p819_p9) target bundleno = 130 (0x82), region = 40 }
  0x82 PF: > { %v1033_v1 = vld [vmem:[%s1557_s3 + $0x8] ss:$0 sps:$4 sm:$0x33]   ;;  %v1034_v2 = vld [vmem:[%s1557_s3 + $0x4] ss:$0 sps:$4 sm:$0x33]   ;;  %v471_v60 = vlaneseq }
  0x83   : > { %s1314_s5 = smov 16   ;;  %v1035_v3 = vld [vmem:[%s1557_s3 + $0x8] ss:$0 sps:$4 sm:$0x77]   ;;  %s1315_s15 = smov 8   ;;  %v1316_v41 = vmov 0.0  }
  0x84   : > { %368 = vrot.lane.b32.xlu1 %v1033_v1, %s1314_s5  ;;  %366 = vrot.lane.b32.xlu0 %v1034_v2, %s1314_s5  ;;  %v1036_v4 = vld [vmem:[%s1557_s3] ss:$0 sps:$4 sm:$0x77]   ;;  %v333_v5 = vshrl.u32 %v1035_v3, 16  ;;  %v335_v6 = vshll.u32 %v1035_v3, 16  ;;  %s860_s25 = sshll.u32 %s1283_s21, 4 }
  0x85   : > { %v319_v7 = vshrl.u32 %v1036_v4, 16  ;;  %v321_v8 = vshll.u32 %v1036_v4, 16  ;;  %v1037_v9 = vld [vmem:[%s1557_s3 + $0xc] ss:$0 sps:$4 sm:$0x77]   ;;  %871 = vmatprep.subr.bf16.mxu0 %v1316_v41  ;;  %s457_s22 = scalar_lea.vmem [#allocation6], %s860_s25 }
  0x86   : > { %v337_v10 = vrot.slane %v335_v6, 1  ;;  %v1038_v11 = vld [vmem:[%s1557_s3 + $0x4] ss:$0 sps:$4 sm:$0x77]   ;;  %v340_v13 = vshrl.u32 %v1037_v9, 16  ;;  %v342_v14 = vshll.u32 %v1037_v9, 16 }
  0x87   : > { %v323_v12 = vrot.slane %v321_v8, 1  ;;  %v326_v16 = vshrl.u32 %v1038_v11, 16  ;;  %v328_v17 = vshll.u32 %v1038_v11, 16  ;;  %v1041_v21 = vld [vmem:[%s1557_s3 + $0x8] ss:$0 sps:$4 sm:$0x77]  }
  0x88   : > { %v338_v15 = vor.u32 %v337_v10, %v333_v5  ;;  %v344_v19 = vrot.slane %v342_v14, 1  ;;  %v1042_v23 = vld [vmem:[%s1557_s3 + $0x4] ss:$0 sps:$4 sm:$0x77]   ;;  %v396_v26 = vshll.u32 %v1041_v21, 16  ;;  %v394_v30 = vshrl.u32 %v1041_v21, 16 }
  0x89   : > { %v324_v18 = vor.u32 %v323_v12, %v319_v7  ;;  %v330_v20 = vrot.slane %v328_v17, 1  ;;  %v1043_v24 = vld [vmem:[%s1557_s3 + $0x10] ss:$0 sps:$4 sm:$0x77]   ;;  %v389_v28 = vshll.u32 %v1042_v23, 16  ;;  %v387_v34 = vshrl.u32 %v1042_v23, 16 }
  0x8a   : > { %350 = vrot.lane.b32.xlu1 %v338_v15, %s1315_s15  ;;  %v345_v22 = vor.u32 %v344_v19, %v340_v13  ;;  %v1039_v27 = vld [vmem:[%s1557_s3 + $0x10] ss:$0 sps:$4 sm:$0x33]   ;;  %v410_v29 = vshll.u32 %v1043_v24, 16  ;;  %v398_v31 = vrot.slane %v396_v26, 1  ;;  %v408_v37 = vshrl.u32 %v1043_v24, 16 }
  0x8b   : > { %346 = vrot.lane.b32.xlu0 %v324_v18, %s1315_s15  ;;  %v331_v25 = vor.u32 %v330_v20, %v326_v16  ;;  %v1044_v32 = vld [vmem:[%s1557_s3 + $0xc] ss:$0 sps:$4 sm:$0x77]   ;;  %v391_v35 = vrot.slane %v389_v28, 1  ;;  %v1045_v42 = vld [vmem:[%s457_s22] sm:$0xff]   ;;  %v1046_v45 = vld [vmem:[%s457_s22 + $0x8] sm:$0xff]  }
  0x8c   : > { %v1040_v33 = vld [vmem:[%s1557_s3 + $0xc] ss:$0 sps:$4 sm:$0x33]   ;;  %v403_v36 = vshll.u32 %v1044_v32, 16  ;;  %v412_v38 = vrot.slane %v410_v29, 1  ;;  %v399_v39 = vor.u32 %v398_v31, %v394_v30  ;;  %v401_v40 = vshrl.u32 %v1044_v32, 16  ;;  %872 = vmatpush3.bf16.msra.mxu0 %v1045_v42 }
  0x8d   : > { %v392_v43 = vor.u32 %v391_v35, %v387_v34  ;;  %vm1317_vm0 = vmmov 0   ;;  %873 = vmatprep.subr.bf16.mxu0 %v1316_v41  ;;  %s1318_s27 = smov 24   ;;  %vm422_vm1 = vcmask 64512   ;;  %v289_v54 = vld [vmem:[%s1557_s3] sm:$0x3]  ;;  %vm435_vm2 = vcmask 130048  }
  0x8e   : > { %352 = vrot.lane.b32.xlu1 %v345_v22, %s1315_s15  ;;  %v405_v44 = vrot.slane %v403_v36, 1  ;;  %875 = vmatprep.mubr.msk.bf16.mxu0 %vm1317_vm0, %v1316_v41  ;;  %v413_v46 = vor.u32 %v412_v38, %v408_v37  ;;  %v290_v55 = vld [vmem:[%s1557_s3 + $0x4] sm:$0x3]  ;;  %v1319_v58 = vmov 1983009808   ;;  %vm444_vm3 = vcmask 195584  }
  0x8f   : > { %348 = vrot.lane.b32.xlu0 %v331_v25, %s1315_s15  ;;  %v469_v59 = vunpack.c.l.s4 %v1319_v58  ;;  %v292_v63 = vld [vmem:[%s1557_s3 + $0xc] sm:$0x3]  ;;  %v291_v1 = vld [vmem:[%s1557_s3 + $0x8] sm:$0x3]  ;;  %v472_v4 = vshrl.u32 %v471_v60, 7  ;;  %vm495_vm4 = vcmask 261120  }
  0x90   : > { %v406_v47 = vor.u32 %v405_v44, %v401_v40  ;;  %874 = vmatpush3.bf16.msra.mxu0 %v1046_v45  ;;  %v453_v23 = vld [vmem:[#allocation2] sm:$0xff]  ;;  %v454_v25 = vld [vmem:[#allocation2 + $0x8] sm:$0xff]  ;;  %p845_p11 = scmp.ne.s32.totalorder %s1283_s21, 1 }
  0x91   : > { %v470_v3 = vunpack.c.0.s8 %v469_v59 }
  0x92   : > { %372 = vrot.lane.b32.xlu1 %v1039_v27, %s1314_s5 }
  0x93   : > { %370 = vrot.lane.b32.xlu0 %v1040_v33, %s1314_s5  ;;  %v473_v14 = vsub.s32 %v470_v3, %v472_v4 }
  0x96   : > { %416 = vrot.lane.b32.xlu1 %v399_v39, %s1318_s27 }
  0x97   : > { %414 = vrot.lane.b32.xlu0 %v392_v43, %s1318_s27 }
  0x9a   : > { %420 = vrot.lane.b32.xlu1 %v413_v46, %s1318_s27 }
  0x9b   : > { %418 = vrot.lane.b32.xlu0 %v406_v47, %s1318_s27 }
  0xf6   : > { %v369_v48 = vpop.permute.xlu1 %368  ;;  %v367_v49 = vpop.permute.xlu0 %366 }
  0xfc   : > { %v351_v50 = vpop.permute.xlu1 %350 }
  0xfd   : > { %v347_v51 = vpop.permute.xlu0 %346  ;;  %v431_v10 = vsel %vm422_vm1, %v291_v1, %v351_v50 }
  0xfe   : > { %v425_v61 = vsel %vm422_vm1, %v289_v54, %v347_v51 }
  0xff   : > { %v437_v6 = vsel %vm435_vm2, %v425_v61, %v367_v49 }
 0x100   : > { %v353_v52 = vpop.permute.xlu1 %352 }
 0x101   : > { %v349_v53 = vpop.permute.xlu0 %348  ;;  %v434_v9 = vsel %vm422_vm1, %v292_v63, %v353_v52 }
 0x102   : > { %v428_v62 = vsel %vm422_vm1, %v290_v55, %v349_v53 }
 0x103   : > { %v439_v2 = vsel %vm435_vm2, %v428_v62, %v369_v48 }
 0x104   : > { %v373_v56 = vpop.permute.xlu1 %372 }
 0x105   : > { %v371_v57 = vpop.permute.xlu0 %370  ;;  %v443_v11 = vsel %vm435_vm2, %v434_v9, %v373_v56 }
 0x106   : > { %v441_v13 = vsel %vm435_vm2, %v431_v10, %v371_v57 }
 0x108   : > { %v417_v0 = vpop.permute.xlu1 %416 }
 0x109   : > { %v415_v5 = vpop.permute.xlu0 %414  ;;  %v448_v7 = vsel %vm444_vm3, %v439_v2, %v417_v0 }
 0x10a   : > { %v446_v8 = vsel %vm444_vm3, %v437_v6, %v415_v5 }
 0x10b   : > { %v466_v15 = vcombine.low %v446_v8, %v448_v7 }
 0x10c   : > { %v421_v12 = vpop.permute.xlu1 %420 }
 0x10d   : > { %v452_v16 = vsel %vm444_vm3, %v443_v11, %v421_v12  ;;  %v419_v17 = vpop.permute.xlu0 %418  ;;  %v474_v20 = vrot.slane %v466_v15, %v473_v14 }
 0x10e   : > { %v450_v18 = vsel %vm444_vm3, %v441_v13, %v419_v17 }
 0x10f   : > { %v467_v19 = vcombine.low %v450_v18, %v452_v16 }
 0x111   : > { %v481_v21 = vrot.slane %v467_v19, %v473_v14 }
 0x113   : > { %v482_v22 = vcombine.low %v474_v20, %v481_v21 }
 0x115   : > { %876 = vmatmul.mubr.msk.bf16.vlgmr.msra.gmra.mrb[0].mxu0 %vm495_vm4, %v482_v22 }
 0x1e7   : > { %547 = sbr.rel (%p845_p11) target bundleno = 518 (0x206), region = 44 }
 0x1e8   : > { %v533_v24 = vpop.f32.mrb[0].mxu0 }
 0x1e9   : > { %v540_v26 = vadd.f32 %v533_v24, %v453_v23  ;;  %v877_v27 = vpop.f32.mrb[1].mxu0 }
 0x1ea   : > { %v536_v28 = vpop.f32.mrb[2].mxu0 }
 0x1eb   : > { %542 = vst [vmem:[#allocation2] sm:$0xff] %v540_v26  ;;  %v541_v29 = vadd.f32 %v536_v28, %v454_v25  ;;  %v878_v30 = vpop.f32.mrb[3].mxu0 }
 0x1ed   : > { %543 = vst [vmem:[#allocation2 + $0x8] sm:$0xff] %v541_v29 }
 0x1f2   : > { %v548_v31 = vld [vmem:[#allocation2] sm:$0xff] }
 0x1f3   : > { %v568_v35 = vmul.f32 %v548_v31, %v548_v31 }
 0x1f4   : > { %v549_v32 = vld [vmem:[#allocation2 + $0x8] sm:$0xff] }
 0x1f5   : > { %v866_v33 = vpack.c.bf16 %v549_v32, %v548_v31  ;;  %v560_v34 = vadd.f32 %v549_v32, %v548_v31  ;;  %v569_v36 = vmul.f32 %v549_v32, %v549_v32 }
 0x1f7   : > { %867 = vst [vmem:[%s266_s8] sm:$0xff] %v866_v33   ;;  %v561_v37 = vrot.slane %v560_v34, 4  ;;  %v570_v38 = vadd.f32 %v569_v36, %v568_v35 }
 0x1f9   : > { %v562_v39 = vadd.f32 %v561_v37, %v560_v34  ;;  %v571_v40 = vrot.slane %v570_v38, 4 }
 0x1fb   : > { %v563_v41 = vrot.slane %v562_v39, 2  ;;  %v572_v42 = vadd.f32 %v571_v40, %v570_v38 }
 0x1fd   : > { %v564_v43 = vadd.f32 %v563_v41, %v562_v39  ;;  %v573_v44 = vrot.slane %v572_v42, 2 }
 0x1ff   : > { %v565_v45 = vrot.slane %v564_v43, 1  ;;  %v574_v46 = vadd.f32 %v573_v44, %v572_v42 }
 0x201   : > { %v566_v47 = vadd.f32 %v565_v45, %v564_v43  ;;  %v575_v48 = vrot.slane %v574_v46, 1 }
 0x203   : > { %567 = vst [vmem:[%s273_s12] sm:$0xff] %v566_v47  ;;  %v576_v49 = vadd.f32 %v575_v48, %v574_v46 }
 0x205   : > { %577 = vst [vmem:[%s280_s4] sm:$0xff] %v576_v49 }
 0x206 PF: > { %s1821_s21 = sld [smem:[#allocation17_spill]]  ;;  %s1822_s29 = sld [smem:[#allocation21_spill]] }
 0x207   : > { %s583_s30 = sand.u32 1, %s1414_s28   ;;  %s854_s13 = sshll.u32 %s1291_s23, 2 }
 0x208   : > { %s622_s10 = sshll.u32 %s273_s12, 4  ;;  %s1823_s24 = sld [smem:[#allocation28_spill]]  ;;  %s623_s10 = int_to_ptr.vmem [resolvable:$true] %s622_s10 }
 0x209   : > { %s1631_s15 = scalar_lea.sflag [#allocation10], %s583_s30  ;;  %s1105_s25 = scalar_lea.vmem %s623_s10, 128 }
 0x20a   : > { %p1106_p13 = scmp.ne.s32.totalorder %s623_s10, %s1105_s25  ;;  %s1320_s28 = smov [#allocation9]  }
 0x20b   : > { %s1109_s22 = sshll.u32 %s1320_s28, 4  ;;  %s1110_s22 = int_to_ptr.vmem [resolvable:$false] %s1109_s22 }
 0x20c   : > { %s1619_s18 = sadd.s32 %s1821_s21, %s854_s13  ;;  %p1825_p0 = scmp.ne.s32.totalorder %s1822_s29, 0 }
 0x20d   : > { %s855_s11 = sshll.u32 %s1619_s18, 7  ;;  %s1111_s27 = scalar_lea.vmem %s1110_s22, 256 }
 0x20e   : > { %s1824_s3 = smov %s1823_s24  ;;  %s1629_s5 = scalar_lea.hbm %s1823_s24, %s855_s11 }
 0x20f   : > { %p1107_p4 = pnand %p1106_p13, %p1825_p0  ;;  %p1112_p6 = scmp.lt.s32.totalorder %s623_s10, %s1110_s22 }
 0x210   : > { %p1113_p10 = scmp.lt.s32.totalorder %s1111_s27, %s1105_s25 }
 0x211   : > { %p1108_p5 = pneg %p1107_p4 }
 0x212   : > { %p1114_p1 = por %p1113_p10, %p1112_p6 }
 0x214   : > { %p1115_p3 = pnand %p1114_p1, %p1108_p5 }
 0x216   : > { %1118 = shalt.err (!%p1115_p3)
}
 0x217   : > { %s1119_s12 = scalar_lea.hbm %s1629_s5, 128  ;;  %s1123_s7 = scalar_lea.hbm %s1824_s3, 1024 }
 0x218   : > { %p1120_p8 = scmp.ne.s32.totalorder %s1629_s5, %s1119_s12  ;;  %p1124_p2 = scmp.lt.u32.totalorder %s1629_s5, %s1824_s3 }
 0x219   : > { %p1125_p9 = scmp.lt.u32.totalorder %s1123_s7, %s1119_s12  ;;  %p1127_p13 = scmp.lt.u32.totalorder %s1119_s12, %s1629_s5 }
 0x21a   : > { %p1121_p12 = pnand %p1120_p8, %p1825_p0 }
 0x21b   : > { %p1126_p11 = por %p1125_p9, %p1124_p2 }
 0x21c   : > { %p1122_p7 = pneg %p1121_p12 }
 0x21d   : > { %p1128_p4 = por %p1127_p13, %p1126_p11 }
 0x21f   : > { %p1129_p5 = pnand %p1128_p4, %p1122_p7 }
 0x221   : > { %1132 = shalt.err (!%p1129_p5)
}
 0x222   : > { %890 = dma.vmem_to_hbm [thread:$0]  (%p1825_p0), %s623_s10, 128, %s1629_s5, %s1631_s15  }
 0x223   : > { %s851_s25 = sshll.u32 %s1821_s21, 1  ;;  %s852_s28 = sshll.u32 %s1291_s23, 3 }
 0x224   : > { %s604_s22 = sshll.u32 %s266_s8, 4  ;;  %s601_s27 = sadd.s32 %s852_s28, %s851_s25  ;;  %s1655_s22 = int_to_ptr.vmem [resolvable:$true] %s604_s22 }
 0x225   : > { %s853_s12 = sshll.u32 %s601_s27, 6  ;;  %s1826_s7 = sld [smem:[#allocation27_spill]] }
 0x226   : > { %s1664_s24 = scalar_lea.sflag [#allocation5], %s264_s1  ;;  %s1133_s10 = scalar_lea.vmem %s1655_s22, 128 }
 0x227   : > { %p1134_p6 = scmp.ne.s32.totalorder %s1655_s22, %s1133_s10  ;;  %s1321_s23 = smov [#allocation8]  }
 0x228   : > { %s1137_s8 = sshll.u32 %s1321_s23, 4  ;;  %s1138_s8 = int_to_ptr.vmem [resolvable:$false] %s1137_s8 }
 0x229   : > { %p1135_p10 = pnand %p1134_p6, %p1825_p0  ;;  %s1139_s21 = scalar_lea.vmem %s1138_s8, 256 }
 0x22a   : > { %p1140_p3 = scmp.lt.s32.totalorder %s1655_s22, %s1138_s8  ;;  %p1141_p8 = scmp.lt.s32.totalorder %s1139_s21, %s1133_s10 }
 0x22b   : > { %s1660_s9 = scalar_lea.hbm %s1826_s7, %s853_s12  ;;  %p1136_p1 = pneg %p1135_p10 }
 0x22c   : > { %p1142_p12 = por %p1141_p8, %p1140_p3 }
 0x22e   : > { %p1143_p7 = pnand %p1142_p12, %p1136_p1 }
 0x230   : > { %1146 = shalt.err (!%p1143_p7)
}
 0x231   : > { %s1147_s1 = scalar_lea.hbm %s1660_s9, 128  ;;  %s1151_s28 = scalar_lea.hbm %s1826_s7, 1024 }
 0x232   : > { %p1148_p2 = scmp.ne.s32.totalorder %s1660_s9, %s1147_s1  ;;  %p1152_p13 = scmp.lt.u32.totalorder %s1660_s9, %s1826_s7 }
 0x233   : > { %p1153_p4 = scmp.lt.u32.totalorder %s1151_s28, %s1147_s1  ;;  %p1155_p6 = scmp.lt.u32.totalorder %s1147_s1, %s1660_s9 }
 0x234   : > { %p1149_p9 = pnand %p1148_p2, %p1825_p0 }
 0x235   : > { %p1154_p5 = por %p1153_p4, %p1152_p13 }
 0x236   : > { %p1150_p11 = pneg %p1149_p9 }
 0x237   : > { %p1156_p10 = por %p1155_p6, %p1154_p5 }
 0x239   : > { %p1157_p1 = pnand %p1156_p10, %p1150_p11 }
 0x23b   : > { %1160 = shalt.err (!%p1157_p1)
}
 0x23c   : > { %s1322_s30 = smov 64   ;;  %s1323_s13 = smov 4  }
 0x23d   : > { %889 = dma.vmem_to_hbm [thread:$0]  (%p1825_p0), %s1655_s22, 128, %s1660_s9, %s1664_s24, %s1322_s30, %s1322_s30, %s1323_s13  }
 0x23e   : > { %s1827_s8 = sld [smem:[#allocation29_spill]]  ;;  %s637_s1 = sshll.u32 %s280_s4, 4  ;;  %s638_s1 = int_to_ptr.vmem [resolvable:$true] %s637_s1 }
 0x23f   : > { %s1161_s5 = scalar_lea.vmem %s638_s1, 128  ;;  %s1324_s25 = smov [#allocation11]  }
 0x240   : > { %p1162_p3 = scmp.ne.s32.totalorder %s638_s1, %s1161_s5  ;;  %s1165_s28 = sshll.u32 %s1324_s25, 4  ;;  %s1166_s28 = int_to_ptr.vmem [resolvable:$false] %s1165_s28 }
 0x241   : > { %s1167_s27 = scalar_lea.vmem %s1166_s28, 256  ;;  %p1168_p7 = scmp.lt.s32.totalorder %s638_s1, %s1166_s28 }
 0x242   : > { %p1163_p8 = pnand %p1162_p3, %p1825_p0  ;;  %p1169_p2 = scmp.lt.s32.totalorder %s1167_s27, %s1161_s5 }
 0x244   : > { %s1693_s21 = scalar_lea.hbm %s1827_s8, %s855_s11  ;;  %p1164_p12 = pneg %p1163_p8 }
 0x245   : > { %p1170_p9 = por %p1169_p2, %p1168_p7 }
 0x247   : > { %p1171_p11 = pnand %p1170_p9, %p1164_p12 }
 0x249   : > { %1174 = shalt.err (!%p1171_p11)
}
 0x24a   : > { %s1175_s6 = scalar_lea.hbm %s1693_s21, 128  ;;  %s1179_s11 = scalar_lea.hbm %s1827_s8, 1024 }
 0x24b   : > { %p1176_p13 = scmp.ne.s32.totalorder %s1693_s21, %s1175_s6  ;;  %p1180_p6 = scmp.lt.u32.totalorder %s1693_s21, %s1827_s8 }
 0x24c   : > { %p1181_p10 = scmp.lt.u32.totalorder %s1179_s11, %s1175_s6  ;;  %p1183_p3 = scmp.lt.u32.totalorder %s1175_s6, %s1693_s21 }
 0x24d   : > { %p1177_p4 = pnand %p1176_p13, %p1825_p0 }
 0x24e   : > { %p1182_p1 = por %p1181_p10, %p1180_p6 }
 0x24f   : > { %p1178_p5 = pneg %p1177_p4 }
 0x250   : > { %p1184_p8 = por %p1183_p3, %p1182_p1 }
 0x252   : > { %p1185_p12 = pnand %p1184_p8, %p1178_p5 }
 0x254   : > { %1188 = shalt.err (!%p1185_p12)
}
 0x255   : > { %891 = dma.vmem_to_hbm [thread:$0]  (%p1825_p0), %s638_s1, 128, %s1693_s21, %s1631_s15  }
 0x256 PF: > { %s1828_s24 = sld [smem:[#allocation20_spill]]  ;;  %s1829_s12 = sld [smem:[#allocation16_spill]] }
 0x257   : > { %s1830_s30 = sld [smem:[#allocation22_spill]] }
 0x25c   : > { %p916_p7 = scmp.ge.s32.totalorder %s1828_s24, 2  ;;  %s649_s13 = sand.u32 1, %s1829_s12  }
 0x25d   : > { %p1831_p2 = scmp.ne.s32.totalorder %s1830_s30, 0  ;;  %s650_s10 = scalar_lea.sflag [#allocation5], %s649_s13 }
 0x25f   : > { %p904_p9 = pnand %p916_p7, %p1831_p2 }
 0x261   : > { %1250 = dma.done.wait (!%p904_p9), %s650_s10, 128  }
 0x262   : > { %1252 = vsyncadd (!%p904_p9), %s650_s10, 4294967168  ;;  %s1832_s23 = sadd.s32 4294967294, %s1828_s24  }
 0x263   : > { %s658_s5 = sand.u32 1, %s1832_s23  }
 0x264   : > { %s659_s25 = scalar_lea.sflag [#allocation10], %s658_s5 }
 0x265   : > { %1254 = dma.done.wait (!%p904_p9), %s659_s25, 256  }
 0x266   : > { %1256 = vsyncadd (!%p904_p9), %s659_s25, 4294967040  ;;  %s25_s27 = sadd.s32 1, %s1828_s24   ;;  %s1834_s21 = sld [smem:[#allocation18_spill]] }
 0x267   : > { %p1722_p0 = scmp.ge.s32.totalorder %s25_s27, 18   ;;  %s1835_s22 = sld [smem:[#allocation19_spill]] }
 0x268   : > { %s1836_s24 = sld [smem:[#allocation23_spill]]  ;;  %s1837_s25 = sld [smem:[#allocation24_spill]] }
 0x269   : > { %s1838_s1 = sld [smem:[#allocation25_spill]]  ;;  %s1839_s15 = smov %s1263_s16 }
 0x26a   : > { %s1840_s16 = smov %s1267_s17  ;;  %s1841_s17 = smov %s1514_s14 }
 0x26b   : > { %s1842_s18 = smov %s1275_s19  ;;  %s1843_s19 = smov %s1279_s20 }
 0x26c   : > { %s1844_s20 = smov %s1509_s2  ;;  %s1845_s23 = smov %s1303_s26 }
 0x26d   :  { %24 = sbr.rel (!%p1722_p0) target bundleno = 18 (0x12), region = 119 }
 0x26f   : > { %s1846_s26 = smov %s1838_s1 }
 0x274   :  { %673 = vsyncpa [#allocation4], 1 }
 0x275   :  { %675 = vsyncpa [#allocation4 + $0x1], 1 }
 0x276   :  { %676 = vsyncpa [#allocation7], 1 }
 0x277   :  { %677 = vsyncpa [#allocation5], 1 }
 0x278   :  { %679 = vsyncpa [#allocation5 + $0x1], 1 }
 0x279   :  { %680 = vsyncpa [#allocation10], 1 }
 0x27a   :  { %682 = vsyncpa [#allocation10 + $0x1], 1 }

</bundles_post_ra>
